<compile_context>
chip_gen: v7x
topology: tpu7x:2x2x1
jax: 0.10.0
libtpu: 0.0.40
codegen_flags: <defaults>
</compile_context>

<pallas_src>
import functools
import math

import jax
import jax.numpy as jnp
from jax.experimental import pallas as pl
from jax.experimental.pallas import tpu as pltpu


def _clip_head_kernel(x_ref, wkv_ref, bkv_ref, q_ref, vc_ref, sc_ref,
                      m_ref, mt_ref, wo_ref, bo_ref, wl_ref, bl_ref,
                      o_ref, *, num_heads):
    x = x_ref[0]                                   # (TB, N, D) bf16 tokens
    tb, n, d = x.shape
    h = num_heads

    x2 = x.reshape(tb * n, d)

    # K/V projection of the patch tokens only (token Q columns are never used).
    kv = jnp.dot(x2, wkv_ref[...],
                 preferred_element_type=jnp.float32) + bkv_ref[...]        # (TB*N, 2D) f32
    kt = kv[:, :d]                                                         # token keys
    vt = kv[:, d:]                                                         # token values

    # Per-head scores against the pre-scaled CLS query via the head one-hot matmul.
    q = q_ref[...]                                 # (1, D) f32, already * 1/sqrt(hd)
    s_t = jnp.dot(q * kt, m_ref[...],
                  preferred_element_type=jnp.float32)                      # (TB*N, H)

    s_t3 = s_t.reshape(tb, n, h)
    s_c3 = sc_ref[...].reshape(1, 1, h)            # CLS self-score (precomputed)
    m_b = jnp.maximum(jnp.max(s_t3, axis=1, keepdims=True), s_c3)          # (TB, 1, H)
    p_c = jnp.exp(s_c3 - m_b)                                              # (TB, 1, H)
    p_t = jnp.exp(s_t3 - m_b)                                              # (TB, N, H)
    inv = pl.reciprocal(p_c + jnp.sum(p_t, axis=1, keepdims=True), approx=True)
    pn_c = (p_c * inv).reshape(tb, h)                                      # (TB, H)
    pn_t = p_t * inv                                                       # (TB, N, H)

    # Value mixing: contract over N on the MXU (batched over TB), then select the
    # block-diagonal (per-head) entries with the one-hot transpose.
    vt3 = vt.reshape(tb, n, d)
    pn_th = jnp.swapaxes(pn_t, 1, 2)                                       # (TB, H, N)
    ctx = jnp.einsum("bhn,bnd->bhd", pn_th, vt3,
                     preferred_element_type=jnp.float32)                   # (TB, H, D)
    mmt = mt_ref[...]                                                      # (H, D) one-hot
    attn = jnp.sum(ctx * mmt[None], axis=1)                                # (TB, D)
    attn = attn + jnp.dot(pn_c, mmt,
                          preferred_element_type=jnp.float32) * vc_ref[...]

    # MHA output projection + final linear projection (bf16 operands, f32 acc).
    attn = jnp.dot(attn.astype(wo_ref.dtype), wo_ref[...],
                   preferred_element_type=jnp.float32) + bo_ref[...]       # (TB, D)
    y = jnp.dot(attn.astype(wl_ref.dtype), wl_ref[...],
                preferred_element_type=jnp.float32) + bl_ref[...]          # (TB, OUT_PAD)

    # F.normalize(dim=-1): x / max(||x||, eps) == x * rsqrt(max(||x||^2, eps^2)).
    # Zero-padded lanes contribute nothing to the norm.
    y = y * jax.lax.rsqrt(jnp.maximum(jnp.sum(y * y, axis=-1, keepdims=True), 1e-24))

    o_ref[0] = y.astype(o_ref.dtype)


def _choose_tiles(batch, max_tb):
    """Pick (tile, grid) with padding instead of degrading to tiny odd tiles."""
    tb = max(1, min(batch, max_tb))
    g = -(-batch // tb)
    if g == 1 and tb > 1:
        # Keep g >= 2 so ("parallel",) can split across both TensorCores on v7x.
        tb = -(-tb // 2)
        g = -(-batch // tb)
    return tb, g


def clip_projection_head(tokens, params, *, num_heads, max_batch_tile=8,
                         compute_dtype=jnp.bfloat16):
    """tokens: (B, N, D) float32.  Returns (B, out_dim) float32."""
    B, N, D = tokens.shape
    out_dim = params["linear_bias"].shape[-1]
    hd = D // num_heads
    scale = 1.0 / math.sqrt(hd)

    tb, g = _choose_tiles(B, max_batch_tile)
    pad_b = g * tb - B
    out_pad = ((out_dim + 127) // 128) * 128

    # ---- wrapper-side prep: layout plumbing + tiny CLS-only math ----
    tok = tokens.astype(compute_dtype)
    if pad_b:
        tok = jnp.pad(tok, ((0, pad_b), (0, 0), (0, 0)))
    tokens_r = tok.reshape(g, tb, N, D)

    w_in = params["in_proj_weight"]                      # (3D, D) rows = [wq; wk; wv]
    b_in = params["in_proj_bias"]                        # (3D,)
    wq, wk, wv = w_in[:D], w_in[D:2 * D], w_in[2 * D:]
    bq, bk, bv = b_in[:D], b_in[D:2 * D], b_in[2 * D:]

    # Tokens only need K and V columns; drop the token-Q third of the projection.
    w_kv_t = jnp.concatenate([wk, wv], axis=0).T.astype(compute_dtype)   # (D, 2D)
    b_kv = jnp.concatenate([bk, bv]).reshape(1, 2 * D).astype(jnp.float32)

    # CLS branch hoisted out of the kernel (weights + CLS token only, f32).
    cls = params["cls_token"].reshape(1, D).astype(jnp.float32)
    q_scaled = (cls @ wq.T + bq) * scale                 # (1, D), 1/sqrt(hd) folded in
    kc = cls @ wk.T + bk                                 # (1, D)
    vc = cls @ wv.T + bv                                 # (1, D)
    s_c = (q_scaled * kc).reshape(num_heads, hd).sum(-1).reshape(1, num_heads)

    wo_t = params["out_proj_weight"].T.astype(compute_dtype)             # (D, D)
    bo = params["out_proj_bias"].reshape(1, D).astype(jnp.float32)
    wl_t = params["linear_weight"].T.astype(jnp.float32)                 # (D, out_dim)
    bl = params["linear_bias"].reshape(1, out_dim).astype(jnp.float32)
    if out_pad != out_dim:
        wl_t = jnp.pad(wl_t, ((0, 0), (0, out_pad - out_dim)))
        bl = jnp.pad(bl, ((0, 0), (0, out_pad - out_dim)))
    wl_t = wl_t.astype(compute_dtype)

    # Head one-hot indicator (D, H) and its transpose, built once in the wrapper.
    head_idx = jnp.arange(D) // hd
    m_onehot = jax.nn.one_hot(head_idx, num_heads, dtype=jnp.float32)    # (D, H)
    m_onehot_t = m_onehot.T                                              # (H, D)

    def const_spec(shape):
        zeros = (0,) * len(shape)
        # Grid-invariant operand: fetch once, single buffer (no wasted VMEM).
        return pl.BlockSpec(shape, lambda i, _z=zeros: _z,
                            pipeline_mode=pl.Buffered(1))

    out = pl.pallas_call(
        functools.partial(_clip_head_kernel, num_heads=num_heads),
        out_shape=jax.ShapeDtypeStruct((g, tb, out_pad), jnp.float32),
        grid_spec=pltpu.PrefetchScalarGridSpec(
            num_scalar_prefetch=0,
            grid=(g,),
            in_specs=[
                pl.BlockSpec((1, tb, N, D), lambda i: (i, 0, 0, 0)),  # token tile (bf16)
                const_spec((D, 2 * D)),        # K/V weight (pre-transposed, bf16)
                const_spec((1, 2 * D)),        # K/V bias (f32)
                const_spec((1, D)),            # CLS query, pre-scaled (f32)
                const_spec((1, D)),            # CLS value (f32)
                const_spec((1, num_heads)),    # CLS per-head score (f32)
                const_spec((D, num_heads)),    # head one-hot M
                const_spec((num_heads, D)),    # M.T
                const_spec((D, D)),            # out-proj weight (bf16)
                const_spec((1, D)),            # out-proj bias (f32)
                const_spec((D, out_pad)),      # linear weight (bf16, lane-padded)
                const_spec((1, out_pad)),      # linear bias (f32, lane-padded)
            ],
            out_specs=pl.BlockSpec((1, tb, out_pad), lambda i: (i, 0, 0)),
        ),
        compiler_params=pltpu.CompilerParams(
            dimension_semantics=("parallel",),
            vmem_limit_bytes=40 * 1024 * 1024,
        ),
    )(tokens_r, w_kv_t, b_kv, q_scaled, vc, s_c, m_onehot, m_onehot_t,
      wo_t, bo, wl_t, bl)

    return out.reshape(g * tb, out_pad)[:B, :out_dim]


def reference(tokens, params, *, num_heads):
    """Pure-JAX f32 reference matching the PyTorch forward (inference mode)."""
    B, N, D = tokens.shape
    hd = D // num_heads
    cls = jnp.broadcast_to(params["cls_token"], (B, 1, D))
    x = jnp.concatenate([cls, tokens], axis=1)
    wq, wk, wv = jnp.split(params["in_proj_weight"], 3, axis=0)
    bq, bk, bv = jnp.split(params["in_proj_bias"], 3, axis=0)
    q = x[:, :1] @ wq.T + bq
    k = x @ wk.T + bk
    v = x @ wv.T + bv
    qh = q.reshape(B, 1, num_heads, hd).transpose(0, 2, 1, 3)
    kh = k.reshape(B, N + 1, num_heads, hd).transpose(0, 2, 1, 3)
    vh = v.reshape(B, N + 1, num_heads, hd).transpose(0, 2, 1, 3)
    s = jnp.einsum("bhqd,bhkd->bhqk", qh, kh) / jnp.sqrt(jnp.float32(hd))
    p = jax.nn.softmax(s, axis=-1)
    o = jnp.einsum("bhqk,bhkd->bhqd", p, vh).transpose(0, 2, 1, 3).reshape(B, 1, D)[:, 0]
    o = o @ params["out_proj_weight"].T + params["out_proj_bias"]
    y = o @ params["linear_weight"].T + params["linear_bias"]
    return y / jnp.maximum(jnp.linalg.norm(y, axis=-1, keepdims=True), 1e-12)


if __name__ == "__main__":
    # Small shapes consistent with the module (token_dim=D, num_heads divides D).
    B, N, D, H, OUT = 2, 8, 32, 4, 16

    key = jax.random.PRNGKey(0)
    ks = jax.random.split(key, 8)
    params = {
        "cls_token":       jax.random.normal(ks[0], (1, 1, D), jnp.float32),
        "in_proj_weight":  0.05 * jax.random.normal(ks[1], (3 * D, D), jnp.float32),
        "in_proj_bias":    0.01 * jax.random.normal(ks[2], (3 * D,), jnp.float32),
        "out_proj_weight": 0.05 * jax.random.normal(ks[3], (D, D), jnp.float32),
        "out_proj_bias":   0.01 * jax.random.normal(ks[4], (D,), jnp.float32),
        "linear_weight":   0.05 * jax.random.normal(ks[5], (OUT, D), jnp.float32),
        "linear_bias":     0.01 * jax.random.normal(ks[6], (OUT,), jnp.float32),
    }
    tokens = jax.random.normal(ks[7], (B, N, D), jnp.float32)

    out = clip_projection_head(tokens, params, num_heads=H)
    out = jax.block_until_ready(out)

    ref = reference(tokens, params, num_heads=H)
    # bf16 matmul operands (f32 accumulation) + approx reciprocal -> looser tolerance
    # than the pure-f32 version; outputs are unit-normalized so atol is meaningful.
    if not jnp.allclose(out, ref, atol=3e-2, rtol=3e-2):
        raise AssertionError("Pallas kernel output does not match reference")

    # TODO(synk): training-mode dropout randomness is not implemented (inference identity).
    print("KERNEL_OK")
</pallas_src>

<mosaic_0001>
module attributes {stable_mosaic.version = 11 : i64} {
  func.func @_clip_head_kernel(%arg0: i32, %arg1: memref<1x1x8x32xbf16, #tpu.memory_space<vmem>>, %arg2: memref<32x64xbf16, #tpu.memory_space<vmem>>, %arg3: memref<1x64xf32, #tpu.memory_space<vmem>>, %arg4: memref<1x32xf32, #tpu.memory_space<vmem>>, %arg5: memref<1x32xf32, #tpu.memory_space<vmem>>, %arg6: memref<1x4xf32, #tpu.memory_space<vmem>>, %arg7: memref<32x4xf32, #tpu.memory_space<vmem>>, %arg8: memref<4x32xf32, #tpu.memory_space<vmem>>, %arg9: memref<32x32xbf16, #tpu.memory_space<vmem>>, %arg10: memref<1x32xf32, #tpu.memory_space<vmem>>, %arg11: memref<32x128xbf16, #tpu.memory_space<vmem>>, %arg12: memref<1x128xf32, #tpu.memory_space<vmem>>, %arg13: memref<1x1x128xf32, #tpu.memory_space<vmem>>) attributes {dimension_semantics = [#tpu.dimension_semantics<parallel>], iteration_bounds = array<i64: 2>, scalar_prefetch = 0 : i64, scratch_operands = 0 : i64, tpu.core_type = #tpu.core_type<tc>, window_params = [{transform_indices = @transform_0, window_bounds = array<i64: 1, 1, 8, 32>}, {pipeline_mode = #tpu.pipeline_mode<synchronous>, transform_indices = @transform_1, window_bounds = array<i64: 32, 64>}, {pipeline_mode = #tpu.pipeline_mode<synchronous>, transform_indices = @transform_2, window_bounds = array<i64: 1, 64>}, {pipeline_mode = #tpu.pipeline_mode<synchronous>, transform_indices = @transform_3, window_bounds = array<i64: 1, 32>}, {pipeline_mode = #tpu.pipeline_mode<synchronous>, transform_indices = @transform_4, window_bounds = array<i64: 1, 32>}, {pipeline_mode = #tpu.pipeline_mode<synchronous>, transform_indices = @transform_5, window_bounds = array<i64: 1, 4>}, {pipeline_mode = #tpu.pipeline_mode<synchronous>, transform_indices = @transform_6, window_bounds = array<i64: 32, 4>}, {pipeline_mode = #tpu.pipeline_mode<synchronous>, transform_indices = @transform_7, window_bounds = array<i64: 4, 32>}, {pipeline_mode = #tpu.pipeline_mode<synchronous>, transform_indices = @transform_8, window_bounds = array<i64: 32, 32>}, {pipeline_mode = #tpu.pipeline_mode<synchronous>, transform_indices = @transform_9, window_bounds = array<i64: 1, 32>}, {pipeline_mode = #tpu.pipeline_mode<synchronous>, transform_indices = @transform_10, window_bounds = array<i64: 32, 128>}, {pipeline_mode = #tpu.pipeline_mode<synchronous>, transform_indices = @transform_11, window_bounds = array<i64: 1, 128>}, {transform_indices = @transform_12, window_bounds = array<i64: 1, 1, 128>}]} {
    %c0 = arith.constant 0 : index
    %c0_0 = arith.constant 0 : index
    %c0_1 = arith.constant 0 : index
    %c0_2 = arith.constant 0 : index
    %0 = vector.load %arg1[%c0, %c0_0, %c0_1, %c0_2] : memref<1x1x8x32xbf16, #tpu.memory_space<vmem>>, vector<1x1x8x32xbf16>
    %1 = vector.shape_cast %0 : vector<1x1x8x32xbf16> to vector<1x8x32xbf16>
    %2 = vector.shape_cast %1 : vector<1x8x32xbf16> to vector<8x32xbf16>
    %c0_3 = arith.constant 0 : index
    %c0_4 = arith.constant 0 : index
    %3 = vector.load %arg2[%c0_3, %c0_4] : memref<32x64xbf16, #tpu.memory_space<vmem>>, vector<32x64xbf16>
    %cst = arith.constant dense<0.000000e+00> : vector<8x64xf32>
    %4 = tpu.matmul %2, %3, %cst {dimension_numbers = #tpu.dot_dimension_numbers<[1], [0], [0], [1], [0, 0, 1, 1], [], []>} : vector<8x32xbf16>, vector<32x64xbf16>, vector<8x64xf32> -> vector<8x64xf32>
    %c0_5 = arith.constant 0 : index
    %c0_6 = arith.constant 0 : index
    %5 = vector.load %arg3[%c0_5, %c0_6] : memref<1x64xf32, #tpu.memory_space<vmem>>, vector<1x64xf32>
    %6 = vector.broadcast %5 : vector<1x64xf32> to vector<8x64xf32>
    %7 = arith.addf %4, %6 : vector<8x64xf32>
    %8 = vector.extract_strided_slice %7 {offsets = [0, 0], sizes = [8, 32], strides = [1, 1]} : vector<8x64xf32> to vector<8x32xf32>
    %9 = vector.extract_strided_slice %7 {offsets = [0, 32], sizes = [8, 32], strides = [1, 1]} : vector<8x64xf32> to vector<8x32xf32>
    %c0_7 = arith.constant 0 : index
    %c0_8 = arith.constant 0 : index
    %10 = vector.load %arg4[%c0_7, %c0_8] : memref<1x32xf32, #tpu.memory_space<vmem>>, vector<1x32xf32>
    %11 = vector.broadcast %10 : vector<1x32xf32> to vector<8x32xf32>
    %12 = arith.mulf %11, %8 : vector<8x32xf32>
    %c0_9 = arith.constant 0 : index
    %c0_10 = arith.constant 0 : index
    %13 = vector.load %arg7[%c0_9, %c0_10] : memref<32x4xf32, #tpu.memory_space<vmem>>, vector<32x4xf32>
    %cst_11 = arith.constant dense<0.000000e+00> : vector<8x4xf32>
    %14 = tpu.matmul %12, %13, %cst_11 {dimension_numbers = #tpu.dot_dimension_numbers<[1], [0], [0], [1], [0, 0, 1, 1], [], []>} : vector<8x32xf32>, vector<32x4xf32>, vector<8x4xf32> -> vector<8x4xf32>
    %15 = vector.shape_cast %14 : vector<8x4xf32> to vector<1x8x4xf32>
    %c0_12 = arith.constant 0 : index
    %c0_13 = arith.constant 0 : index
    %16 = vector.load %arg6[%c0_12, %c0_13] : memref<1x4xf32, #tpu.memory_space<vmem>>, vector<1x4xf32>
    %17 = vector.shape_cast %16 : vector<1x4xf32> to vector<1x1x4xf32>
    %cst_14 = arith.constant dense<0xFF800000> : vector<1x4xf32>
    %18 = vector.multi_reduction <maximumf>, %15, %cst_14 [1] : vector<1x8x4xf32> to vector<1x4xf32>
    %19 = vector.shape_cast %18 : vector<1x4xf32> to vector<1x1x4xf32>
    %20 = arith.maximumf %19, %17 : vector<1x1x4xf32>
    %21 = arith.subf %17, %20 : vector<1x1x4xf32>
    %22 = math.exp %21 : vector<1x1x4xf32>
    %23 = vector.broadcast %20 : vector<1x1x4xf32> to vector<1x8x4xf32>
    %24 = arith.subf %15, %23 : vector<1x8x4xf32>
    %25 = math.exp %24 : vector<1x8x4xf32>
    %cst_15 = arith.constant dense<0.000000e+00> : vector<1x4xf32>
    %26 = vector.multi_reduction <add>, %25, %cst_15 [1] : vector<1x8x4xf32> to vector<1x4xf32>
    %27 = vector.shape_cast %26 : vector<1x4xf32> to vector<1x1x4xf32>
    %28 = arith.addf %22, %27 : vector<1x1x4xf32>
    %29 = tpu.reciprocal %28 {approx = true} : vector<1x1x4xf32> -> vector<1x1x4xf32>
    %30 = arith.mulf %22, %29 : vector<1x1x4xf32>
    %31 = vector.shape_cast %30 : vector<1x1x4xf32> to vector<1x4xf32>
    %32 = vector.broadcast %29 : vector<1x1x4xf32> to vector<1x8x4xf32>
    %33 = arith.mulf %25, %32 : vector<1x8x4xf32>
    %34 = vector.shape_cast %9 : vector<8x32xf32> to vector<1x8x32xf32>
    %35 = tpu.transpose %33, [0, 2, 1] : vector<1x8x4xf32> -> vector<1x4x8xf32>
    "tpu.trace_start"() <{level = 10 : i32, message = "bhn,bnd->bhd"}> : () -> ()
    %cst_16 = arith.constant dense<0.000000e+00> : vector<1x4x32xf32>
    %36 = tpu.matmul %35, %34, %cst_16 {dimension_numbers = #tpu.dot_dimension_numbers<[2], [1], [1], [2], [0, 0, 0, 1, 1, 2], [0], [0]>} : vector<1x4x8xf32>, vector<1x8x32xf32>, vector<1x4x32xf32> -> vector<1x4x32xf32>
    "tpu.trace_stop"() : () -> ()
    %c0_17 = arith.constant 0 : index
    %c0_18 = arith.constant 0 : index
    %37 = vector.load %arg8[%c0_17, %c0_18] : memref<4x32xf32, #tpu.memory_space<vmem>>, vector<4x32xf32>
    %38 = vector.shape_cast %37 : vector<4x32xf32> to vector<1x4x32xf32>
    %39 = arith.mulf %36, %38 : vector<1x4x32xf32>
    %cst_19 = arith.constant dense<0.000000e+00> : vector<1x32xf32>
    %40 = vector.multi_reduction <add>, %39, %cst_19 [1] : vector<1x4x32xf32> to vector<1x32xf32>
    %cst_20 = arith.constant dense<0.000000e+00> : vector<1x32xf32>
    %41 = tpu.matmul %31, %37, %cst_20 {dimension_numbers = #tpu.dot_dimension_numbers<[1], [0], [0], [1], [0, 0, 1, 1], [], []>} : vector<1x4xf32>, vector<4x32xf32>, vector<1x32xf32> -> vector<1x32xf32>
    %c0_21 = arith.constant 0 : index
    %c0_22 = arith.constant 0 : index
    %42 = vector.load %arg5[%c0_21, %c0_22] : memref<1x32xf32, #tpu.memory_space<vmem>>, vector<1x32xf32>
    %43 = arith.mulf %41, %42 : vector<1x32xf32>
    %44 = arith.addf %40, %43 : vector<1x32xf32>
    %45 = arith.truncf %44 : vector<1x32xf32> to vector<1x32xbf16>
    %c0_23 = arith.constant 0 : index
    %c0_24 = arith.constant 0 : index
    %46 = vector.load %arg9[%c0_23, %c0_24] : memref<32x32xbf16, #tpu.memory_space<vmem>>, vector<32x32xbf16>
    %cst_25 = arith.constant dense<0.000000e+00> : vector<1x32xf32>
    %47 = tpu.matmul %45, %46, %cst_25 {dimension_numbers = #tpu.dot_dimension_numbers<[1], [0], [0], [1], [0, 0, 1, 1], [], []>} : vector<1x32xbf16>, vector<32x32xbf16>, vector<1x32xf32> -> vector<1x32xf32>
    %c0_26 = arith.constant 0 : index
    %c0_27 = arith.constant 0 : index
    %48 = vector.load %arg10[%c0_26, %c0_27] : memref<1x32xf32, #tpu.memory_space<vmem>>, vector<1x32xf32>
    %49 = arith.addf %47, %48 : vector<1x32xf32>
    %50 = arith.truncf %49 : vector<1x32xf32> to vector<1x32xbf16>
    %c0_28 = arith.constant 0 : index
    %c0_29 = arith.constant 0 : index
    %51 = vector.load %arg11[%c0_28, %c0_29] : memref<32x128xbf16, #tpu.memory_space<vmem>>, vector<32x128xbf16>
    %cst_30 = arith.constant dense<0.000000e+00> : vector<1x128xf32>
    %52 = tpu.matmul %50, %51, %cst_30 {dimension_numbers = #tpu.dot_dimension_numbers<[1], [0], [0], [1], [0, 0, 1, 1], [], []>} : vector<1x32xbf16>, vector<32x128xbf16>, vector<1x128xf32> -> vector<1x128xf32>
    %c0_31 = arith.constant 0 : index
    %c0_32 = arith.constant 0 : index
    %53 = vector.load %arg12[%c0_31, %c0_32] : memref<1x128xf32, #tpu.memory_space<vmem>>, vector<1x128xf32>
    %54 = arith.addf %52, %53 : vector<1x128xf32>
    %55 = arith.mulf %54, %54 : vector<1x128xf32>
    %cst_33 = arith.constant dense<0.000000e+00> : vector<1xf32>
    %56 = vector.multi_reduction <add>, %55, %cst_33 [1] : vector<1x128xf32> to vector<1xf32>
    %57 = vector.shape_cast %56 : vector<1xf32> to vector<1x1xf32>
    %cst_34 = arith.constant 1.000000e-24 : f32
    %58 = vector.broadcast %cst_34 : f32 to vector<1x1xf32>
    %59 = arith.maximumf %57, %58 : vector<1x1xf32>
    %60 = math.rsqrt %59 : vector<1x1xf32>
    %61 = vector.broadcast %60 : vector<1x1xf32> to vector<1x128xf32>
    %62 = arith.mulf %54, %61 : vector<1x128xf32>
    %c0_35 = arith.constant 0 : index
    %c0_36 = arith.constant 0 : index
    %c0_37 = arith.constant 0 : index
    %63 = vector.load %arg13[%c0_35, %c0_36, %c0_37] : memref<1x1x128xf32, #tpu.memory_space<vmem>>, vector<1x1x128xf32>
    %64 = vector.shape_cast %63 : vector<1x1x128xf32> to vector<1x128xf32>
    %65 = vector.shape_cast %62 : vector<1x128xf32> to vector<1x1x128xf32>
    tpu.vector_store %arg13[%c0_35, %c0_36, %c0_37], %65 {strides = array<i32>} : memref<1x1x128xf32, #tpu.memory_space<vmem>>, vector<1x1x128xf32>,
    return
  }
  func.func @transform_0(%arg0: i32) -> (i32, i32, i32, i32) {
    %c0_i32 = arith.constant 0 : i32
    %c0_i32_0 = arith.constant 0 : i32
    %c0_i32_1 = arith.constant 0 : i32
    %c0_i32_2 = arith.constant 0 : i32
    return %arg0, %c0_i32, %c0_i32_0, %c0_i32_1 : i32, i32, i32, i32
  }
  func.func @transform_1(%arg0: i32) -> (i32, i32) {
    %c0_i32 = arith.constant 0 : i32
    %c0_i32_0 = arith.constant 0 : i32
    %c0_i32_1 = arith.constant 0 : i32
    return %c0_i32, %c0_i32_0 : i32, i32
  }
  func.func @transform_2(%arg0: i32) -> (i32, i32) {
    %c0_i32 = arith.constant 0 : i32
    %c0_i32_0 = arith.constant 0 : i32
    %c0_i32_1 = arith.constant 0 : i32
    return %c0_i32, %c0_i32_0 : i32, i32
  }
  func.func @transform_3(%arg0: i32) -> (i32, i32) {
    %c0_i32 = arith.constant 0 : i32
    %c0_i32_0 = arith.constant 0 : i32
    %c0_i32_1 = arith.constant 0 : i32
    return %c0_i32, %c0_i32_0 : i32, i32
  }
  func.func @transform_4(%arg0: i32) -> (i32, i32) {
    %c0_i32 = arith.constant 0 : i32
    %c0_i32_0 = arith.constant 0 : i32
    %c0_i32_1 = arith.constant 0 : i32
    return %c0_i32, %c0_i32_0 : i32, i32
  }
  func.func @transform_5(%arg0: i32) -> (i32, i32) {
    %c0_i32 = arith.constant 0 : i32
    %c0_i32_0 = arith.constant 0 : i32
    %c0_i32_1 = arith.constant 0 : i32
    return %c0_i32, %c0_i32_0 : i32, i32
  }
  func.func @transform_6(%arg0: i32) -> (i32, i32) {
    %c0_i32 = arith.constant 0 : i32
    %c0_i32_0 = arith.constant 0 : i32
    %c0_i32_1 = arith.constant 0 : i32
    return %c0_i32, %c0_i32_0 : i32, i32
  }
  func.func @transform_7(%arg0: i32) -> (i32, i32) {
    %c0_i32 = arith.constant 0 : i32
    %c0_i32_0 = arith.constant 0 : i32
    %c0_i32_1 = arith.constant 0 : i32
    return %c0_i32, %c0_i32_0 : i32, i32
  }
  func.func @transform_8(%arg0: i32) -> (i32, i32) {
    %c0_i32 = arith.constant 0 : i32
    %c0_i32_0 = arith.constant 0 : i32
    %c0_i32_1 = arith.constant 0 : i32
    return %c0_i32, %c0_i32_0 : i32, i32
  }
  func.func @transform_9(%arg0: i32) -> (i32, i32) {
    %c0_i32 = arith.constant 0 : i32
    %c0_i32_0 = arith.constant 0 : i32
    %c0_i32_1 = arith.constant 0 : i32
    return %c0_i32, %c0_i32_0 : i32, i32
  }
  func.func @transform_10(%arg0: i32) -> (i32, i32) {
    %c0_i32 = arith.constant 0 : i32
    %c0_i32_0 = arith.constant 0 : i32
    %c0_i32_1 = arith.constant 0 : i32
    return %c0_i32, %c0_i32_0 : i32, i32
  }
  func.func @transform_11(%arg0: i32) -> (i32, i32) {
    %c0_i32 = arith.constant 0 : i32
    %c0_i32_0 = arith.constant 0 : i32
    %c0_i32_1 = arith.constant 0 : i32
    return %c0_i32, %c0_i32_0 : i32, i32
  }
  func.func @transform_12(%arg0: i32) -> (i32, i32, i32) {
    %c0_i32 = arith.constant 0 : i32
    %c0_i32_0 = arith.constant 0 : i32
    %c0_i32_1 = arith.constant 0 : i32
    return %arg0, %c0_i32, %c0_i32_0 : i32, i32, i32
  }
}

</mosaic_0001>

<bundles_post_ra>
// kernel: tpu_custom_call.1
= control target key start
LH: loop header
LB: loop body
LE: loop exit
PB: predicated region body
PF: predicated region fallthrough
CT: control target
= control target key end

     0   :  { %s1786_s0 = inlined_call_operand.hbm [shape: bf16[2,1,8,32], index: 0, kind: input, shape index: {}]   ;;  %s1787_s1 = inlined_call_operand.vmem [shape: bf16[32,64], index: 1, kind: input, shape index: {}]   ;;  %s1788_s2 = inlined_call_operand.vmem [shape: f32[1,64], index: 2, kind: input, shape index: {}]   ;;  %s1789_s3 = inlined_call_operand.vmem [shape: f32[1,32], index: 3, kind: input, shape index: {}]   ;;  %s1790_s4 = inlined_call_operand.hbm [shape: f32[1,32], index: 4, kind: input, shape index: {}]   ;;  %s1791_s5 = inlined_call_operand.hbm [shape: f32[1,4], index: 5, kind: input, shape index: {}]   ;;  %s1792_s6 = inlined_call_operand.vmem [shape: f32[32,4], index: 6, kind: input, shape index: {}]   ;;  %s1793_s7 = inlined_call_operand.vmem [shape: f32[4,32], index: 7, kind: input, shape index: {}]   ;;  %s1794_s8 = inlined_call_operand.vmem [shape: bf16[32,32], index: 8, kind: input, shape index: {}]   ;;  %s1795_s9 = inlined_call_operand.vmem [shape: f32[1,32], index: 9, kind: input, shape index: {}]   ;;  %s1796_s10 = inlined_call_operand.vmem [shape: bf16[32,128], index: 10, kind: input, shape index: {}]   ;;  %s1797_s11 = inlined_call_operand.vmem [shape: f32[1,128], index: 11, kind: input, shape index: {}]   ;;  %s1798_s12 = inlined_call_operand.hbm [shape: f32[2,1,128], index: 12, kind: output, shape index: {}]  }
   0x1   :  { %1805 = sst [smem:[#allocation14_spill]] %s1790_s4 }
   0x2   :  { %1806 = sst [smem:[#allocation15_spill]] %s1798_s12 }
   0x3   :  { %17 = vsyncpa [#allocation3], 0 }
   0x4   :  { %19 = vsyncpa [#allocation3 + $0x1], 0 }
   0x5   :  { %20 = vsyncpa [#allocation6], 0 }
   0x6   :  { %21 = vsyncpa [#allocation4], 0 }
   0x7   :  { %23 = vsyncpa [#allocation4 + $0x1], 0  ;;  %s1487_s21 = smov 0   ;;  %s1489_s22 = smov 0  }
   0x8   :  { %s1491_s23 = smov 0   ;;  %s1493_s24 = smov 0  }
   0x9 LB: > { %1807 = sst [smem:[#allocation12_spill]] %s1400_s21  ;;  %s1508_s25 = sadd.s32 4294967295, %s1412_s24   ;;  %s1412_s24 = sphi %s1493_s24, %s1830_s24   ;;  %s1408_s23 = sphi %s1491_s23, %s1829_s23   ;;  %s1404_s22 = sphi %s1489_s22, %s1828_s22   ;;  %s1400_s21 = sphi %s1487_s21, %s1827_s21  }
   0xa   : > { %s1073_s26 = sadd.s32 4294967294, %s1412_s24   ;;  %p49_p0 = scmp.ne.s32.totalorder %s1404_s22, %s1400_s21 }
   0xb   : > { %p1801_p1 = scmp.eq.s32.totalorder %s1508_s25, 0  ;;  %p310_p3 = scmp.eq.s32.totalorder %s1073_s26, 1 }
   0xc   : > { %p1074_p5 = scmp.ge.s32.totalorder %s1412_s24, 1  ;;  %p317_p7 = scmp.lt.s32.totalorder %s1412_s24, 3 }
   0xd   : > { %p1517_p4 = por %p1801_p1, %p49_p0  ;;  %p1522_p6 = por %p310_p3, %p49_p0 }
   0xe   : > { %p1527_p8 = pnand %p1074_p5, %p317_p7  ;;  %s1414_s30 = smov [#allocation5]  }
   0xf   : > { %s1808_s27 = scalar_select %p1517_p4, 1, 0 }
  0x10   : > { %s1809_s28 = scalar_select %p1522_p6, 1, 0 }
  0x11   : > { %s1811_s29 = scalar_select %p1527_p8, 1, 0 }
  0x12   : > { %1810 = sst [smem:[#allocation13_spill]] %s1809_s28  ;;  %s339_s13 = sshll.u32 %s1414_s30, 4  ;;  %s340_s13 = int_to_ptr.vmem [resolvable:$true] %s339_s13 }
  0x13   : > { %p1183_p10 = pneg %p1527_p8  ;;  %s1415_s14 = smov [#allocation7]  }
  0x14   : > { %s350_s15 = sshll.u32 %s1415_s14, 4  ;;  %s1543_s17 = sadd.s32 1, %s1412_s24   ;;  %s1540_s15 = int_to_ptr.vmem [resolvable:$true] %s350_s15 }
  0x15   : > { %p1536_p11 = pnand %p1183_p10, %p1801_p1  ;;  %s1813_s4 = sld [smem:[#allocation14_spill]] }
  0x17   : > { %p1258_p13 = pneg %p1536_p11 }
  0x1b   : > { %s1256_s26 = scalar_lea.hbm %s1813_s4, 16 }
  0x1c   : > { %p1257_p12 = scmp.ne.s32.totalorder %s1813_s4, %s1256_s26  ;;  %p1263_p5 = scmp.lt.u32.totalorder %s1256_s26, %s1813_s4 }
  0x1e   : > { %p1259_p0 = pnand %p1258_p13, %p1257_p12 }
  0x20   : > { %p1260_p3 = pneg %p1259_p0 }
  0x22   : > { %p1265_p7 = pnand %p1263_p5, %p1260_p3 }
  0x24   : > { %1268 = shalt.err (!%p1265_p7)
}
  0x25   : > { %s1269_s18 = scalar_lea.vmem %s340_s13, 16  ;;  %s1276_s28 = scalar_lea.vmem %s340_s13, 32 }
  0x26   : > { %p1270_p10 = scmp.ne.s32.totalorder %s340_s13, %s1269_s18  ;;  %p1277_p2 = scmp.lt.s32.totalorder %s340_s13, %s340_s13 }
  0x27   : > { %p1278_p6 = scmp.lt.s32.totalorder %s1276_s28, %s1269_s18 }
  0x28   : > { %p1272_p9 = pnand %p1270_p10, %p1258_p13 }
  0x29   : > { %p1279_p4 = por %p1278_p6, %p1277_p2 }
  0x2a   : > { %p1273_p1 = pneg %p1272_p9 }
  0x2c   : > { %p1280_p8 = pnand %p1279_p4, %p1273_p1 }
  0x2e   : > { %1283 = shalt.err (!%p1280_p8)
}
  0x2f   : > { %1186 = dma.hbm_to_vmem [thread:$0]  (!%p1536_p11), %s1813_s4, 16, %s340_s13, [#allocation6]  }
  0x30   : > { %s1284_s30 = scalar_lea.hbm %s1791_s5, 16 }
  0x31   : > { %p1285_p9 = scmp.ne.s32.totalorder %s1791_s5, %s1284_s30  ;;  %p1291_p4 = scmp.lt.u32.totalorder %s1284_s30, %s1791_s5 }
  0x33   : > { %p1287_p2 = pnand %p1285_p9, %p1258_p13 }
  0x35   : > { %p1288_p1 = pneg %p1287_p2 }
  0x37   : > { %p1293_p6 = pnand %p1291_p4, %p1288_p1 }
  0x39   : > { %1296 = shalt.err (!%p1293_p6)
}
  0x3a   : > { %s1297_s13 = scalar_lea.vmem %s1540_s15, 16  ;;  %s1304_s12 = scalar_lea.vmem %s1540_s15, 32 }
  0x3b   : > { %p1298_p8 = scmp.ne.s32.totalorder %s1540_s15, %s1297_s13  ;;  %p1305_p3 = scmp.lt.s32.totalorder %s1540_s15, %s1540_s15 }
  0x3c   : > { %p1306_p5 = scmp.lt.s32.totalorder %s1304_s12, %s1297_s13 }
  0x3d   : > { %p1300_p12 = pnand %p1298_p8, %p1258_p13 }
  0x3e   : > { %p1307_p7 = por %p1306_p5, %p1305_p3 }
  0x3f   : > { %p1301_p0 = pneg %p1300_p12 }
  0x41   : > { %p1308_p10 = pnand %p1307_p7, %p1301_p0 }
  0x43   : > { %1311 = shalt.err (!%p1308_p10)
}
  0x44   : > { %1189 = dma.hbm_to_vmem [thread:$0]  (!%p1536_p11), %s1791_s5, 16, %s1540_s15, [#allocation6]  }
  0x45   : > { %s1814_s20 = ssub.s32 %s1412_s24, %s1543_s17  ;;  %s36_s26 = sadd.s32 1, %s1408_s23 }
  0x46   : > { %p34_p13 = scmp.eq.s32.totalorder %s1814_s20, 0  ;;  %p43_p9 = scmp.ne.s32.totalorder %s1408_s23, %s1404_s22 }
  0x47   : > { %p44_p2 = scmp.eq.s32.totalorder %s1412_s24, 0  ;;  %p1815_p4 = scmp.eq.s32.totalorder %s1508_s25, 1 }
  0x48   : > { %s1603_s16 = scalar_select %p34_p13, %s1408_s23, %s36_s26  }
  0x49   : > { %p45_p1 = por %p44_p2, %p43_p9  ;;  %p1607_p6 = por %p1815_p4, %p43_p9 }
  0x4a   : > { %p1200_p8 = scmp.lt.s32.totalorder %s1412_s24, 2  ;;  %s379_s14 = sand.u32 1, %s1408_s23  }
  0x4b   : > { %s1078_s18 = sshll.u32 %s379_s14, 2  ;;  %s1079_s28 = sshll.u32 %s1412_s24, 6 }
  0x4c   : > { %s1617_s15 = scalar_lea.hbm %s1786_s0, %s1079_s28  ;;  %s383_s19 = scalar_lea.vmem [#allocation2], %s1078_s18 }
  0x4d   : > { %s390_s21 = sshll.u32 %s383_s19, 4  ;;  %p1621_p11 = pnand %p1200_p8, %p45_p1  ;;  %s1619_s21 = int_to_ptr.vmem [resolvable:$true] %s390_s21 }
  0x4e   : > { %s380_s26 = scalar_lea.sflag [#allocation3], %s379_s14  ;;  %s1312_s4 = scalar_lea.hbm %s1617_s15, 64 }
  0x4f   : > { %p1313_p12 = scmp.ne.s32.totalorder %s1617_s15, %s1312_s4  ;;  %p1314_p0 = pneg %p1621_p11 }
  0x50   : > { %s1317_s13 = scalar_lea.hbm %s1786_s0, 128  ;;  %p1318_p7 = scmp.lt.u32.totalorder %s1617_s15, %s1786_s0 }
  0x51   : > { %p1315_p3 = pnand %p1314_p0, %p1313_p12  ;;  %p1319_p10 = scmp.lt.u32.totalorder %s1317_s13, %s1312_s4 }
  0x52   : > { %p1321_p9 = scmp.lt.u32.totalorder %s1312_s4, %s1617_s15 }
  0x53   : > { %p1316_p5 = pneg %p1315_p3  ;;  %p1320_p13 = por %p1319_p10, %p1318_p7 }
  0x55   : > { %p1322_p2 = por %p1321_p9, %p1320_p13 }
  0x57   : > { %p1323_p1 = pnand %p1322_p2, %p1316_p5 }
  0x59   : > { %1326 = shalt.err (!%p1323_p1)
}
  0x5a   : > { %s1327_s14 = scalar_lea.vmem %s1619_s21, 64  ;;  %s1416_s28 = smov [#allocation2]  }
  0x5b   : > { %p1328_p4 = scmp.ne.s32.totalorder %s1619_s21, %s1327_s14  ;;  %s1332_s18 = sshll.u32 %s1416_s28, 4  ;;  %s1333_s18 = int_to_ptr.vmem [resolvable:$false] %s1332_s18 }
  0x5c   : > { %s1334_s12 = scalar_lea.vmem %s1333_s18, 128  ;;  %p1335_p3 = scmp.lt.s32.totalorder %s1619_s21, %s1333_s18 }
  0x5d   : > { %p1330_p8 = pnand %p1328_p4, %p1314_p0  ;;  %p1336_p7 = scmp.lt.s32.totalorder %s1334_s12, %s1327_s14 }
  0x5f   : > { %p1331_p12 = pneg %p1330_p8  ;;  %p1337_p10 = por %p1336_p7, %p1335_p3 }
  0x61   : > { %p1338_p13 = pnand %p1337_p10, %p1331_p12 }
  0x63   : > { %1341 = shalt.err (!%p1338_p13)
}
  0x64   : > { %1193 = dma.hbm_to_vmem [thread:$0]  (!%p1621_p11), %s1617_s15, 64, %s1619_s21, %s380_s26  }
  0x65   : > { %p1818_p5 = scmp.ne.s32.totalorder %s1811_s29, 0 }
  0x66   : > { %s1653_s4 = sand.u32 (!%p1818_p5), 1, %s1404_s22   ;;  %p1819_p0 = scmp.ne.s32.totalorder (!%p1818_p5), %s1808_s27, 0 }
  0x67   : > { %399 = sbr.rel (%p1818_p5) target bundleno = 1578 (0x62a), region = 68  ;;  %s1081_s13 = sshll.u32 (!%p1818_p5), %s1653_s4, 2 }
  0x68   : > { %s402_s19 = scalar_lea.sflag (!%p1818_p5), [#allocation3], %s1653_s4  ;;  %s405_s14 = scalar_lea.vmem (!%p1818_p5), [#allocation2], %s1081_s13 }
  0x6e   : > { %1387 = dma.done.wait (%p1819_p0), %s402_s19, 64  }
  0x6f   : > { %1389 = vsyncadd (%p1819_p0), %s402_s19, 4294967232  ;;  %p1820_p9 = scmp.eq.s32.totalorder %s1508_s25, 0 }
  0x71   : > { %1391 = dma.done.wait (%p1820_p9), [#allocation6], 32   ;;  %p1821_p11 = pmov %p1820_p9 }
  0x72   : > { %v1417_v0 = vmov 0.0   ;;  %vm1418_vm0 = vmmov 0   ;;  %v1419_v1 = vmov 0.0|0.0   ;;  %v1242_v2 = vld [vmem:[%s1787_s1] sm:$0xff]   ;;  %v1243_v3 = vld [vmem:[%s1787_s1 + $0x8] sm:$0xff]   ;;  %vm478_vm1 = vcmask 261120  }
  0x73   : > { %1393 = vsyncadd (%p1821_p11), [#allocation6], 4294967264  ;;  %1120 = vmatprep.subr.bf16.mxu0 %v1417_v0  ;;  %1124 = vmatprep.mubr.msk.bf16.mxu0 %vm1418_vm0, %v1417_v0  ;;  %v530_v4 = vld [vmem:[%s1792_s6] sm:$0xff]  ;;  %v531_v5 = vld [vmem:[%s1792_s6 + $0x8] sm:$0xff]  ;;  %s1420_s20 = smov 96   ;;  %vm767_vm2 = vcmask 1043456   ;;  %v620_v26 = vlaneseq }
  0x74   : > { %1165 = vmatprep.subr.bf16.mxu1 %v1419_v1  ;;  %1136 = vmatprep.mubr.msk.f32.mxu1 %vm1418_vm0, %v1417_v0  ;;  %v1166_v6 = vpack.c.bf16 %v531_v5, %v530_v4  ;;  %v454_v7 = vld [vmem:[%s405_s14] sm:$0xf]  ;;  %v532_v8 = vld [vmem:[%s1792_s6 + $0x10] sm:$0xff]  ;;  %v533_v9 = vld [vmem:[%s1792_s6 + $0x18] sm:$0xff]  ;;  %vm608_vm3 = vcmask 31744   ;;  %vm680_vm4 = vcmask 64512  }
  0x75   : > { %1121 = vmatpush3.bf16.msra.mxu0 %v1242_v2  ;;  %v1169_v10 = vpack.c.bf16 %v533_v9, %v532_v8  ;;  %v1084_v11 = vld [vmem:[%s1788_s2] ss:$0 sm:$0xff]  ;;  %v621_v29 = vshrl.u32 %v620_v26, 7  ;;  %v607_v31 = vld [vmem:[#allocation7] sm:$0x1]  ;;  %vm756_vm5 = vcmask 257024  }
  0x76   : > { %1122 = vmatprep.subr.bf16.mxu0 %v1417_v0  ;;  %1167 = vmatpush3.bf16.msra.mxu1 %v1166_v6  ;;  %v1088_v13 = vld [vmem:[%s1789_s3] ss:$0 sm:$0xff]  ;;  %v1245_v58 = vld [vmem:[%s1794_s8 + $0x8] sm:$0xff]   ;;  %vm967_vm6 = vcmask 1040384   ;;  %s1099_s18 = sshll.u32 %s1508_s25, 4  ;;  %s452_s12 = scalar_lea.vmem [#allocation8], %s1653_s4 }
  0x77   : > { %1168 = vmatprep.subr.bf16.mxu1 %v1419_v1  ;;  %v754_v20 = vld [vmem:[%s1793_s7] sm:$0xf]  ;;  %v622_v33 = vsub.s32 0, %v621_v29  ;;  %v841_v5 = vld [vmem:[#allocation5] sm:$0x1]  ;;  %s988_s13 = sshll.u32 %s452_s12, 4  ;;  %s1744_s13 = int_to_ptr.vmem [resolvable:$true] %s988_s13 }
  0x78   : > { %v1244_v57 = vld [vmem:[%s1794_s8] sm:$0xff]   ;;  %s1822_s14 = sld [smem:[#allocation15_spill]]  ;;  %s976_s15 = scalar_lea.sflag [#allocation4], %s1653_s4 }
  0x79   : > { %1123 = vmatpush3.bf16.msra.mxu0 %v1243_v3  ;;  %v1246_v59 = vld [vmem:[%s1796_s10] sm:$0xff]   ;;  %s1342_s21 = scalar_lea.vmem %s1744_s13, 16  ;;  %s1421_s25 = smov [#allocation8]  }
  0x7a   : > { %1144 = vmatprep.subr.mxu0 %v1417_v0  ;;  %1170 = vmatpush3.bf16.msra.mxu1 %v1169_v10  ;;  %p1343_p2 = scmp.ne.s32.totalorder %s1744_s13, %s1342_s21 }
  0x7b   : > { %1139 = vmatprep.subr.mxu1 %v1417_v0 }
  0x7c   : > { %1125 = vmatmul.mubr.msk.bf16.vlgmr.msra.gmra.mrb[0].mxu0 %vm478_vm1, %v454_v7  ;;  %p1344_p1 = pnand %p1343_p2, %p1607_p6 }
  0x7d   : > { %1146 = vmatprep.mubr.msk.f32.mxu0 %vm1418_vm0, %v1417_v0  ;;  %1145 = vmatpush3.msk.msra.mxu0 %vm767_vm2, %v754_v20 }
  0x7e   : > { %1157 = vmatprep.subr.bf16.mxu0 %v1417_v0  ;;  %s1742_s29 = scalar_lea.hbm %s1822_s14, %s1099_s18  ;;  %p1345_p4 = pneg %p1344_p1 }
 0x14f   : > { %v516_v12 = vpop.f32.mrb[0].mxu0 }
 0x150   : > { %v517_v14 = vadd.f32 %v1084_v11, %v516_v12  ;;  %v1126_v15 = vpop.f32.mrb[1].mxu0  ;;  %v849_v11 = vld [vmem:[%s1795_s9] sm:$0x1] }
 0x151   : > { %v519_v16 = vpop.f32.mrb[2].mxu0 }
 0x152   : > { %v529_v17 = vmul.f32 %v1088_v13, %v517_v14  ;;  %677 = vrot.lane.b32.xlu0 %v517_v14, %s1420_s20  ;;  %v1127_v18 = vpop.f32.mrb[3].mxu0  ;;  %s1346_s20 = sshll.u32 %s1421_s25, 4  ;;  %s1347_s20 = int_to_ptr.vmem [resolvable:$false] %s1346_s20 }
 0x153   : > { %v910_v18 = vld [vmem:[%s1797_s11] sm:$0x1]  ;;  %s1348_s26 = scalar_lea.vmem %s1347_s20, 32  ;;  %p1349_p8 = scmp.lt.s32.totalorder %s1744_s13, %s1347_s20 }
 0x154   : > { %1137 = vmatmul.mubr.msk.f32.vlgmr.msra.gmra.mrb[0].mxu1 %vm478_vm1, %v529_v17  ;;  %p1350_p12 = scmp.lt.s32.totalorder %s1348_s26, %s1342_s21 }
 0x155   : > { %1141 = vmatprep.mubr.msk.f32.mxu1 %vm1418_vm0, %v1417_v0 }
 0x156   : > { %p1351_p3 = por %p1350_p12, %p1349_p8 }
 0x158   : > { %p1352_p7 = pnand %p1351_p3, %p1345_p4 }
 0x1c4   : > { %v678_v19 = vpop.permute.xlu0 %677 }
 0x1c5   : > { %1140 = vmatpush3.msra.mxu1 %v678_v19 }
 0x1c6   : > { %1149 = vmatprep.subr.bf16.mxu1 %v1417_v0 }
 0x227   : > { %v603_v21 = vpop.f32.mrb[0].mxu1 }
 0x228   : > { %v609_v22 = vsel %vm608_vm3, %v603_v21, -inf  ;;  %v1138_v23 = vpop.f32.mrb[1].mxu1 }
 0x229   : > { %v610_v24 = vrot.slane %v609_v22, 4 }
 0x22b   : > { %v611_v25 = vmax.f32 %v609_v22, %v610_v24 }
 0x22d   : > { %v612_v27 = vrot.slane %v611_v25, 2 }
 0x22f   : > { %v613_v28 = vmax.f32 %v611_v25, %v612_v27 }
 0x231   : > { %v614_v30 = vrot.slane %v613_v28, 1 }
 0x233   : > { %v615_v32 = vmax.f32 %v613_v28, %v614_v30 }
 0x235   : > { %v616_v34 = vmax.f32 %v615_v32, %v607_v31 }
 0x237   : > { %v623_v35 = vrot.slane %v616_v34, %v622_v33  ;;  %v617_v38 = vsub.f32 %v607_v31, %v616_v34 }
 0x239   : > { %v624_v36 = vsub.f32 %v603_v21, %v623_v35  ;;  %v618_v39 = vmul.f32 1.442695, %v617_v38 }
 0x23b   : > { %v625_v37 = vmul.f32 1.442695, %v624_v36 }
 0x23d   : > { %1248 = vpow2.f32 %v625_v37 }
 0x23e   : > { %1250 = vpow2.f32 %v618_v39 }
 0x247   : > { %v1249_v40 = vpop.eup %1248 }
 0x248   : > { %v627_v41 = vsel %vm608_vm3, %v1249_v40, 0.0  ;;  %v1251_v48 = vpop.eup %1250 }
 0x249   : > { %v628_v42 = vrot.slane %v627_v41, 4 }
 0x24b   : > { %v629_v43 = vadd.f32 %v628_v42, %v627_v41 }
 0x24d   : > { %v630_v44 = vrot.slane %v629_v43, 2 }
 0x24f   : > { %v631_v45 = vadd.f32 %v630_v44, %v629_v43 }
 0x251   : > { %v632_v46 = vrot.slane %v631_v45, 1 }
 0x253   : > { %v633_v47 = vadd.f32 %v632_v46, %v631_v45 }
 0x255   : > { %v634_v49 = vadd.f32 %v1251_v48, %v633_v47 }
 0x257   : > { %1252 = vrcp.f32 %v634_v49 }
 0x261   : > { %v1253_v50 = vpop.eup %1252 }
 0x262   : > { %v636_v51 = vmul.f32 %v1253_v50, %v1251_v48  ;;  %v641_v52 = vrot.slane %v1253_v50, %v622_v33 }
 0x264   : > { %1147 = vmatmul.mubr.msk.f32.vlgmr.msra.gmra.mrb[4].mxu0 %vm608_vm3, %v636_v51  ;;  %v643_v53 = vmul.f32 %v1249_v40, %v641_v52 }
 0x265   : > { %1161 = vmatprep.mubr.msk.bf16.mxu0 %vm1418_vm0, %v1417_v0  ;;  %1158 = vmatpush3.bf16.msra.mxu0 %v1246_v59 }
 0x266   : > { %644 = vxpose.xlu0.b32.start.end [1/1] (short) (narrow) %v643_v53, 8  ;;  %1159 = vmatprep.subr.bf16.mxu0 %v1417_v0 }
 0x2e6   : > { %v660_v54 = vpop.trf.xlu0 }
 0x2e7   : > { %1142 = vmatmul.mubr.msk.f32.vlgmr.msra.gmra.mrb[2].mxu1 %vm680_vm4, %v660_v54 }
 0x2e8   : > { %1153 = vmatprep.mubr.msk.bf16.mxu1 %vm1418_vm0, %v1417_v0  ;;  %1150 = vmatpush3.bf16.msra.mxu1 %v1244_v57 }
 0x2e9   : > { %1151 = vmatprep.subr.bf16.mxu1 %v1417_v0  ;;  %v1247_v0 = vld [vmem:[%s1796_s10 + $0x8] sm:$0xff]  }
 0x2ea   : > { %1160 = vmatpush3.bf16.msra.mxu0 %v1247_v0 }
 0x2ec   : > { %1152 = vmatpush3.bf16.msra.mxu1 %v1245_v58 }
 0x337   : > { %v837_v55 = vpop.f32.mrb[4].mxu0 }
 0x338   : > { %v1148_v56 = vpop.f32.mrb[5].mxu0  ;;  %v842_v7 = vmul.f32 %v841_v5, %v837_v55 }
 0x3ba   : > { %v750_v60 = vpop.f32.mrb[2].mxu1 }
 0x3bb   : > { %v755_v61 = vmul.f32 %v754_v20, %v750_v60  ;;  %v1143_v62 = vpop.f32.mrb[3].mxu1 }
 0x3bd   : > { %v757_v63 = vsel %vm756_vm5, %v755_v61, 0.0 }
 0x3be   : > { %v758_v1 = vrot.slane %v757_v63, 4 }
 0x3c0   : > { %v759_v2 = vadd.f32 %v758_v1, %v757_v63 }
 0x3c2   : > { %v760_v3 = vrot.slane %v759_v2, 2 }
 0x3c4   : > { %v761_v4 = vadd.f32 %v760_v3, %v759_v2 }
 0x3c6   : > { %v762_v6 = vrot.slane %v761_v4, 1 }
 0x3c8   : > { %v763_v8 = vadd.f32 %v762_v6, %v761_v4 }
 0x3ca   : > { %v843_v9 = vadd.f32 %v842_v7, %v763_v8 }
 0x3cc   : > { %v844_v10 = vpack.c.bf16 %v843_v9, %v843_v9 }
 0x3ce   : > { %1154 = vmatmul.mubr.msk.bf16.vlgmr.msra.gmra.mrb[4].mxu1 %vm478_vm1, %v844_v10 }
 0x4a1   : > { %v899_v12 = vpop.f32.mrb[4].mxu1 }
 0x4a2   : > { %v900_v13 = vadd.f32 %v899_v12, %v849_v11  ;;  %v1155_v14 = vpop.f32.mrb[5].mxu1 }
 0x4a3   : > { %v902_v15 = vpop.f32.mrb[6].mxu1 }
 0x4a4   : > { %v905_v16 = vpack.c.bf16 %v900_v13, %v900_v13  ;;  %v1156_v17 = vpop.f32.mrb[7].mxu1 }
 0x4a6   : > { %1162 = vmatmul.mubr.msk.bf16.vlgmr.msra.gmra.mrb[8].mxu0 %vm478_vm1, %v905_v16 }
 0x579   : > { %v960_v19 = vpop.f32.mrb[8].mxu0 }
 0x57a   : > { %v961_v20 = vadd.f32 %v960_v19, %v910_v18  ;;  %v1163_v21 = vpop.f32.mrb[9].mxu0 }
 0x57b   : > { %v963_v22 = vpop.f32.mrb[10].mxu0 }
 0x57c   : > { %v1164_v23 = vpop.f32.mrb[11].mxu0  ;;  %v966_v24 = vmul.f32 %v961_v20, %v961_v20 }
 0x57e   : > { %v968_v25 = vsel %vm967_vm6, %v966_v24, 0.0 }
 0x57f   : > { %969 = vadd.xlane.f32.xlu1 %v968_v25 }
 0x60c   : > { %v970_v26 = vpop.xlane.xlu1 %969 }
 0x60d   : > { %v971_v27 = vmax.f32 %v970_v26, 1e-24 }
 0x60f   : > { %1254 = vrsqrt.f32 %v971_v27 }
 0x619   : > { %v1255_v28 = vpop.eup %1254 }
 0x61a   : > { %v973_v29 = vmul.f32 %v1255_v28, %v961_v20 }
 0x61c   : > { %974 = vst [vmem:[%s452_s12] sm:$0x1] %v973_v29 }
 0x61d   : > { %1355 = shalt.err (!%p1352_p7)
}
 0x61e   : > { %s1356_s4 = scalar_lea.hbm %s1742_s29, 16  ;;  %s1360_s12 = scalar_lea.hbm %s1822_s14, 32 }
 0x61f   : > { %p1357_p10 = scmp.ne.s32.totalorder %s1742_s29, %s1356_s4  ;;  %p1361_p0 = scmp.lt.u32.totalorder %s1742_s29, %s1822_s14 }
 0x620   : > { %p1362_p9 = scmp.lt.u32.totalorder %s1360_s12, %s1356_s4  ;;  %p1364_p2 = scmp.lt.u32.totalorder %s1356_s4, %s1742_s29 }
 0x621   : > { %p1358_p13 = pnand %p1357_p10, %p1607_p6 }
 0x622   : > { %p1363_p11 = por %p1362_p9, %p1361_p0 }
 0x623   : > { %p1359_p5 = pneg %p1358_p13 }
 0x624   : > { %p1365_p1 = por %p1364_p2, %p1363_p11 }
 0x626   : > { %p1366_p4 = pnand %p1365_p1, %p1359_p5 }
 0x628   : > { %1369 = shalt.err (!%p1366_p4)
}
 0x629   : > { %1181 = dma.vmem_to_hbm [thread:$0]  (%p1607_p6), %s1744_s13, 16, %s1742_s29, %s976_s15  }
 0x62a PF: > { %s1823_s21 = sld [smem:[#allocation12_spill]]  ;;  %s1824_s25 = sld [smem:[#allocation13_spill]] }
 0x62b   : > { %p1826_p12 = scmp.ge.s32.totalorder %s1412_s24, 2 }
 0x630   : > { %s1000_s20 = sand.u32 1, %s1823_s21   ;;  %p1825_p8 = scmp.ne.s32.totalorder %s1824_s25, 0 }
 0x631   : > { %s1001_s26 = scalar_lea.sflag [#allocation4], %s1000_s20 }
 0x632   : > { %p1195_p3 = pnand %p1826_p12, %p1825_p8 }
 0x634   : > { %1395 = dma.done.wait (!%p1195_p3), %s1001_s26, 16  }
 0x635   : > { %1397 = vsyncadd (!%p1195_p3), %s1001_s26, 4294967280  ;;  %p26_p7 = scmp.ge.s32.totalorder %s1543_s17, 4   ;;  %s1827_s21 = smov %s1404_s22 }
 0x636   : > { %s1828_s22 = smov %s1408_s23  ;;  %s1829_s23 = smov %s1603_s16 }
 0x637   : > { %s1830_s24 = smov %s1543_s17  ;;  %28 = sbr.rel (!%p26_p7) target bundleno = 9 (0x9), region = 121 }
 0x63e   :  { %1005 = vsyncpa [#allocation3], 1 }
 0x63f   :  { %1007 = vsyncpa [#allocation3 + $0x1], 1 }
 0x640   :  { %1008 = vsyncpa [#allocation6], 1 }
 0x641   :  { %1009 = vsyncpa [#allocation4], 1 }
 0x642   :  { %1011 = vsyncpa [#allocation4 + $0x1], 1 }

</bundles_post_ra>
